<compile_context>
chip_gen: v5e
topology: v5e:2x2
jax: 0.10.0
libtpu: 0.0.40
codegen_flags: <defaults>
</compile_context>

<pallas_src>
import functools
from typing import List, NamedTuple, Sequence, Union

import numpy as np
import jax
import jax.numpy as jnp
from jax.experimental import pallas as pl
from jax.experimental.pallas import tpu as pltpu

LANE = 128


class MLPParams(NamedTuple):
    fc_sizes: List[int]
    fc_act: str = "relu"       # activation for hidden layers
    out_act: str = "identity"  # activation for output layer
    use_layer_norm: bool = False


def _round_up(x: int, m: int) -> int:
    return (x + m - 1) // m * m


def _apply_act(y, act):
    # epilogue stays f32 (v5e has no bf16 VPU/EUP)
    if act == "relu":
        return jnp.maximum(y, 0.0)
    if act == "identity":
        return y
    if act == "tanh":
        return jnp.tanh(y)
    if act == "sigmoid":
        return jax.nn.sigmoid(y)
    if act == "gelu":
        return jax.nn.gelu(y)
    raise ValueError(f"unsupported activation: {act}")


@functools.lru_cache(maxsize=None)
def _vmem_limit_bytes() -> int:
    """Generation-aware scoped-VMEM limit (capacity minus headroom)."""
    cap = None
    try:
        info = pltpu.get_tpu_info()
        cap = int(getattr(info, "vmem_capacity_bytes", 0))
    except Exception:
        cap = None
    if not cap or cap <= 0:
        cap = 64 * 1024 * 1024  # conservative fallback (v7x-sized)
    return max(32 * 1024 * 1024, cap - 16 * 1024 * 1024)


@functools.lru_cache(maxsize=None)
def _single_buffer_params_supported() -> bool:
    """Probe whether pipeline_mode=pl.Buffered(1) compiles & is numerically OK."""
    if not hasattr(pl, "Buffered"):
        return False
    try:
        def k(x_ref, p_ref, o_ref):
            o_ref[...] = x_ref[...] + p_ref[...]

        x = jnp.zeros((16, 128), jnp.float32)
        p = jnp.ones((8, 128), jnp.float32)
        f = pl.pallas_call(
            k,
            out_shape=jax.ShapeDtypeStruct((16, 128), jnp.float32),
            grid=(2,),
            in_specs=[
                pl.BlockSpec((8, 128), lambda i: (i, 0)),
                pl.BlockSpec((8, 128), lambda i: (0, 0),
                             pipeline_mode=pl.Buffered(1)),
            ],
            out_specs=pl.BlockSpec((8, 128), lambda i: (i, 0)),
        )
        out = jax.block_until_ready(f(x, p))
        return bool(jnp.allclose(out, x + 1.0))
    except Exception:
        return False


# ---------------------------------------------------------------------------
# Fused kernel: chains all layers for one batch tile.
# refs = (x_ref, [w_0, b_0, (g_0, beta_0)], ..., [w_L, b_L], o_ref)
# ---------------------------------------------------------------------------
def _mlp_kernel(*refs, n_layers, real_out_dims, use_layer_norm,
                fc_act, out_act, matmul_dtype):
    x_ref = refs[0]
    o_ref = refs[-1]
    param_refs = refs[1:-1]

    h = x_ref[...]                      # (TILE_B, pad_in) in matmul_dtype (bf16)
    idx = 0
    for l in range(n_layers):
        w = param_refs[idx][...]                       # (p_in, p_out) bf16
        b = param_refs[idx + 1][...]                   # (1, p_out) f32
        idx += 2
        is_last = l == n_layers - 1
        ln_here = use_layer_norm and not is_last
        if ln_here:
            gamma = param_refs[idx][...]               # (1, p_out) f32
            beta = param_refs[idx + 1][...]            # (1, p_out) f32
            idx += 2

        # bf16 MXU operands, f32 accumulation; epilogue stays f32.
        y = jnp.dot(h, w, preferred_element_type=jnp.float32) + b

        p_out = w.shape[1]
        r_out = real_out_dims[l]
        need_mask = p_out != r_out

        if ln_here:
            # LayerNorm over the REAL feature width (padded lanes excluded), eps=1e-5.
            if need_mask:
                lane = jax.lax.broadcasted_iota(jnp.int32, (1, p_out), 1)
                col_mask = lane < r_out
                ym = jnp.where(col_mask, y, 0.0)
            else:
                ym = y
            mean = jnp.sum(ym, axis=-1, keepdims=True) * (1.0 / r_out)
            diff = y - mean
            if need_mask:
                diff = jnp.where(col_mask, diff, 0.0)
            var = jnp.sum(diff * diff, axis=-1, keepdims=True) * (1.0 / r_out)
            y = diff * jax.lax.rsqrt(var + 1e-5) * gamma + beta

        y = _apply_act(y, out_act if is_last else fc_act)
        # NOTE: padded lanes are NOT re-zeroed here (perf): the next layer's
        # weight rows for those lanes are zero and the wrapper slices the real
        # output columns, so garbage lanes never leak anywhere visible.

        if is_last:
            o_ref[...] = y.astype(o_ref.dtype)
        else:
            h = y.astype(matmul_dtype)   # bf16 carry: halves VMEM/vst traffic


# ---------------------------------------------------------------------------
# MLP wrapper (mirrors the PyTorch module's forward semantics)
# ---------------------------------------------------------------------------
class MLP:
    def __init__(
        self,
        in_shape: Union[int, Sequence[int]],
        out_shape: Union[int, Sequence[int]],
        params: MLPParams,
        key: jax.Array,
        matmul_dtype=jnp.bfloat16,
    ):
        self.in_shape = list(in_shape) if isinstance(in_shape, Sequence) else [in_shape]
        self.out_shape = list(out_shape) if isinstance(out_shape, Sequence) else [out_shape]
        self.params = params
        self.matmul_dtype = matmul_dtype
        self.in_dim = int(np.prod(self.in_shape))
        self.out_dim = int(np.prod(self.out_shape))
        self.fc_sizes = [self.in_dim] + list(params.fc_sizes) + [self.out_dim]
        self.n_layers = len(self.fc_sizes) - 1
        self.pad_dims = [_round_up(d, LANE) for d in self.fc_sizes]

        # Deterministic init matching nn.Linear default:
        #   U(-1/sqrt(fan_in), 1/sqrt(fan_in)) for both weight and bias.
        # Weights stored transposed (in, out), zero-padded to lane multiples,
        # in bf16 (MXU-native; halves weight DMA). Bias/LN params stay f32.
        self.weights, self.biases, self.gammas, self.betas = [], [], [], []
        for i in range(self.n_layers):
            fan_in, fan_out = self.fc_sizes[i], self.fc_sizes[i + 1]
            p_in, p_out = self.pad_dims[i], self.pad_dims[i + 1]
            bound = 1.0 / np.sqrt(fan_in)
            kw, kb = jax.random.split(jax.random.fold_in(key, i))
            w = jax.random.uniform(kw, (fan_in, fan_out), jnp.float32,
                                   minval=-bound, maxval=bound)
            b = jax.random.uniform(kb, (fan_out,), jnp.float32,
                                   minval=-bound, maxval=bound)
            wp = jnp.zeros((p_in, p_out), matmul_dtype).at[:fan_in, :fan_out].set(
                w.astype(matmul_dtype))
            bp = jnp.zeros((1, p_out), jnp.float32).at[:, :fan_out].set(b)
            self.weights.append(wp)
            self.biases.append(bp)
            if params.use_layer_norm and i < self.n_layers - 1:
                # nn.LayerNorm init: gamma=1, beta=0.
                g = jnp.zeros((1, p_out), jnp.float32).at[:, :fan_out].set(1.0)
                bt = jnp.zeros((1, p_out), jnp.float32)
                self.gammas.append(g)
                self.betas.append(bt)

        flat = []
        for i in range(self.n_layers):
            flat.append(self.weights[i])
            flat.append(self.biases[i])
            if params.use_layer_norm and i < self.n_layers - 1:
                flat.append(self.gammas[i])
                flat.append(self.betas[i])
        self._flat_params = tuple(flat)

        self._single_buffer = _single_buffer_params_supported()
        self._vmem_limit = _vmem_limit_bytes()
        self._forward = jax.jit(self._make_forward())

    def _make_forward(self):
        n_layers = self.n_layers
        use_ln = self.params.use_layer_norm
        fc_act = self.params.fc_act
        out_act = self.params.out_act
        real_out_dims = tuple(self.fc_sizes[1:])
        matmul_dtype = self.matmul_dtype
        pad_in = self.pad_dims[0]
        pad_out = self.pad_dims[-1]
        max_pad = max(self.pad_dims)
        in_dim = self.in_dim
        out_dim = self.out_dim
        single_buffer = self._single_buffer
        vmem_limit = self._vmem_limit

        kernel = functools.partial(
            _mlp_kernel,
            n_layers=n_layers, real_out_dims=real_out_dims,
            use_layer_norm=use_ln, fc_act=fc_act, out_act=out_act,
            matmul_dtype=matmul_dtype)

        act_isize = jnp.dtype(matmul_dtype).itemsize

        def fwd(x2d, flat_params):
            b = x2d.shape[0]

            param_bytes = sum(int(np.prod(p.shape)) * p.dtype.itemsize
                              for p in flat_params)
            param_factor = 1 if single_buffer else 2

            def est(tb):
                # double-buffered bf16 in/out tiles + live f32 y + bf16 h + slack
                io = 2 * tb * (pad_in + pad_out) * act_isize
                live = tb * max_pad * (4 + act_isize)
                return param_factor * param_bytes + io + live + (2 << 20)

            # Largest batch tile (<=512) with <=25% padding waste that fits VMEM.
            tile_b = 8
            min_pb = _round_up(b, 8)
            for cand in (512, 256, 128, 64, 32, 16):
                pb_c = _round_up(b, cand)
                if cand <= min_pb and (pb_c - b) * 4 <= pb_c and est(cand) <= vmem_limit:
                    tile_b = cand
                    break
            # v7x megacore: a 1-step "parallel" grid leaves the 2nd TC idle.
            if _round_up(b, tile_b) // tile_b == 1 and tile_b > 8:
                tile_b //= 2
            pb = _round_up(b, tile_b)

            # Input: bf16 tile; skip the padding copy on already-aligned shapes.
            if in_dim == pad_in and b == pb:
                x_in = x2d.astype(matmul_dtype)
            else:
                x_in = jnp.zeros((pb, pad_in), matmul_dtype).at[:b, :in_dim].set(
                    x2d.astype(matmul_dtype))

            if single_buffer:
                def param_spec(shp):
                    return pl.BlockSpec(shp, lambda i: (0, 0),
                                        pipeline_mode=pl.Buffered(1))
            else:
                def param_spec(shp):
                    return pl.BlockSpec(shp, lambda i: (0, 0))

            in_specs = [pl.BlockSpec((tile_b, pad_in), lambda i: (i, 0))]
            in_specs += [param_spec(p.shape) for p in flat_params]
            out_specs = pl.BlockSpec((tile_b, pad_out), lambda i: (i, 0))

            y_pad = pl.pallas_call(
                kernel,
                out_shape=jax.ShapeDtypeStruct((pb, pad_out), matmul_dtype),
                grid=(pb // tile_b,),
                in_specs=in_specs,
                out_specs=out_specs,
                compiler_params=pltpu.CompilerParams(
                    dimension_semantics=("parallel",),
                    vmem_limit_bytes=int(vmem_limit)),
            )(x_in, *flat_params)

            return y_pad[:b, :out_dim]

        return fwd

    def __call__(self, x: jax.Array) -> jax.Array:
        is_batch = x.ndim == len(self.in_shape) + 1
        h = x.reshape((-1, self.in_dim)) if is_batch else x.reshape((1, self.in_dim))
        y = self._forward(h, self._flat_params).astype(x.dtype)
        if is_batch:
            return y.reshape((-1,) + tuple(self.out_shape))
        return y.reshape(tuple(self.out_shape))


# ---------------------------------------------------------------------------
# Pure-JAX reference (same bf16-operand / f32-accumulate precision)
# ---------------------------------------------------------------------------
def _reference_forward(mlp: MLP, x: jax.Array) -> jax.Array:
    h = x.reshape((-1, mlp.in_dim)).astype(jnp.float32)
    for i in range(mlp.n_layers):
        fi, fo = mlp.fc_sizes[i], mlp.fc_sizes[i + 1]
        w = mlp.weights[i][:fi, :fo]
        b = mlp.biases[i][0, :fo]
        y = jnp.dot(h.astype(mlp.matmul_dtype), w.astype(mlp.matmul_dtype),
                    preferred_element_type=jnp.float32) + b
        is_last = i == mlp.n_layers - 1
        if mlp.params.use_layer_norm and not is_last:
            mean = jnp.mean(y, axis=-1, keepdims=True)
            var = jnp.mean(jnp.square(y - mean), axis=-1, keepdims=True)
            y = (y - mean) * jax.lax.rsqrt(var + 1e-5)
        y = _apply_act(y, mlp.params.out_act if is_last else mlp.params.fc_act)
        h = y
    return h.reshape((-1,) + tuple(mlp.out_shape))


if __name__ == "__main__":
    key = jax.random.PRNGKey(0)
    k_param, k_input = jax.random.split(key)

    batch, in_shape, out_shape = 2, 16, 8
    x = jax.random.normal(k_input, (batch, in_shape), dtype=jnp.float32)

    # config 1: plain MLP
    mlp = MLP(in_shape, out_shape, MLPParams(fc_sizes=[32, 32]), k_param)
    y = mlp(x)
    jax.block_until_ready(y)
    assert y.shape == (batch, out_shape), y.shape
    ref = _reference_forward(mlp, x)
    assert np.allclose(np.asarray(y), np.asarray(ref), rtol=2e-2, atol=2e-2)

    # config 2: with LayerNorm on hidden layers
    mlp_ln = MLP(in_shape, out_shape,
                 MLPParams(fc_sizes=[32, 32], use_layer_norm=True), k_param)
    y_ln = mlp_ln(x)
    jax.block_until_ready(y_ln)
    assert y_ln.shape == (batch, out_shape), y_ln.shape
    ref_ln = _reference_forward(mlp_ln, x)
    assert np.allclose(np.asarray(y_ln), np.asarray(ref_ln), rtol=2e-2, atol=2e-2)

    # config 3: larger batch to exercise a multi-step (parallel) grid
    x_big = jax.random.normal(jax.random.fold_in(k_input, 1), (64, in_shape),
                              dtype=jnp.float32)
    y_big = mlp(x_big)
    jax.block_until_ready(y_big)
    assert y_big.shape == (64, out_shape), y_big.shape
    ref_big = _reference_forward(mlp, x_big)
    assert np.allclose(np.asarray(y_big), np.asarray(ref_big), rtol=2e-2, atol=2e-2)

    print("KERNEL_OK")
</pallas_src>

<mosaic_0001>
module attributes {stable_mosaic.version = 11 : i64} {
  func.func @k(%arg0: i32, %arg1: memref<8x128xf32, #tpu.memory_space<vmem>>, %arg2: memref<8x128xf32, #tpu.memory_space<vmem>>, %arg3: memref<8x128xf32, #tpu.memory_space<vmem>>) attributes {dimension_semantics = [#tpu.dimension_semantics<arbitrary>], iteration_bounds = array<i64: 2>, scalar_prefetch = 0 : i64, scratch_operands = 0 : i64, tpu.core_type = #tpu.core_type<tc>, window_params = [{transform_indices = @transform_0, window_bounds = array<i64: 8, 128>}, {pipeline_mode = #tpu.pipeline_mode<synchronous>, transform_indices = @transform_1, window_bounds = array<i64: 8, 128>}, {transform_indices = @transform_2, window_bounds = array<i64: 8, 128>}]} {
    %c0 = arith.constant 0 : index
    %c0_0 = arith.constant 0 : index
    %0 = vector.load %arg1[%c0, %c0_0] : memref<8x128xf32, #tpu.memory_space<vmem>>, vector<8x128xf32>
    %c0_1 = arith.constant 0 : index
    %c0_2 = arith.constant 0 : index
    %1 = vector.load %arg2[%c0_1, %c0_2] : memref<8x128xf32, #tpu.memory_space<vmem>>, vector<8x128xf32>
    %2 = arith.addf %0, %1 : vector<8x128xf32>
    %c0_3 = arith.constant 0 : index
    %c0_4 = arith.constant 0 : index
    %3 = vector.load %arg3[%c0_3, %c0_4] : memref<8x128xf32, #tpu.memory_space<vmem>>, vector<8x128xf32>
    tpu.vector_store %arg3[%c0_3, %c0_4], %2 {strides = array<i32>} : memref<8x128xf32, #tpu.memory_space<vmem>>, vector<8x128xf32>,
    return
  }
  func.func @transform_0(%arg0: i32) -> (i32, i32) {
    %c0_i32 = arith.constant 0 : i32
    %c0_i32_0 = arith.constant 0 : i32
    return %arg0, %c0_i32 : i32, i32
  }
  func.func @transform_1(%arg0: i32) -> (i32, i32) {
    %c0_i32 = arith.constant 0 : i32
    %c0_i32_0 = arith.constant 0 : i32
    %c0_i32_1 = arith.constant 0 : i32
    return %c0_i32, %c0_i32_0 : i32, i32
  }
  func.func @transform_2(%arg0: i32) -> (i32, i32) {
    %c0_i32 = arith.constant 0 : i32
    %c0_i32_0 = arith.constant 0 : i32
    return %arg0, %c0_i32 : i32, i32
  }
}

module attributes {stable_mosaic.version = 11 : i64} {
  func.func @_mlp_kernel(%arg0: i32, %arg1: memref<8x128xbf16, #tpu.memory_space<vmem>>, %arg2: memref<128x128xbf16, #tpu.memory_space<vmem>>, %arg3: memref<1x128xf32, #tpu.memory_space<vmem>>, %arg4: memref<128x128xbf16, #tpu.memory_space<vmem>>, %arg5: memref<1x128xf32, #tpu.memory_space<vmem>>, %arg6: memref<128x128xbf16, #tpu.memory_space<vmem>>, %arg7: memref<1x128xf32, #tpu.memory_space<vmem>>, %arg8: memref<8x128xbf16, #tpu.memory_space<vmem>>) attributes {dimension_semantics = [#tpu.dimension_semantics<parallel>], iteration_bounds = array<i64: 1>, scalar_prefetch = 0 : i64, scratch_operands = 0 : i64, tpu.core_type = #tpu.core_type<tc>, window_params = [{transform_indices = @transform_0, window_bounds = array<i64: 8, 128>}, {pipeline_mode = #tpu.pipeline_mode<synchronous>, transform_indices = @transform_1, window_bounds = array<i64: 128, 128>}, {pipeline_mode = #tpu.pipeline_mode<synchronous>, transform_indices = @transform_2, window_bounds = array<i64: 1, 128>}, {pipeline_mode = #tpu.pipeline_mode<synchronous>, transform_indices = @transform_3, window_bounds = array<i64: 128, 128>}, {pipeline_mode = #tpu.pipeline_mode<synchronous>, transform_indices = @transform_4, window_bounds = array<i64: 1, 128>}, {pipeline_mode = #tpu.pipeline_mode<synchronous>, transform_indices = @transform_5, window_bounds = array<i64: 128, 128>}, {pipeline_mode = #tpu.pipeline_mode<synchronous>, transform_indices = @transform_6, window_bounds = array<i64: 1, 128>}, {transform_indices = @transform_7, window_bounds = array<i64: 8, 128>}]} {
    %c0 = arith.constant 0 : index
    %c0_0 = arith.constant 0 : index
    %0 = vector.load %arg1[%c0, %c0_0] : memref<8x128xbf16, #tpu.memory_space<vmem>>, vector<8x128xbf16>
    %c0_1 = arith.constant 0 : index
    %c0_2 = arith.constant 0 : index
    %1 = vector.load %arg2[%c0_1, %c0_2] : memref<128x128xbf16, #tpu.memory_space<vmem>>, vector<128x128xbf16>
    %c0_3 = arith.constant 0 : index
    %c0_4 = arith.constant 0 : index
    %2 = vector.load %arg3[%c0_3, %c0_4] : memref<1x128xf32, #tpu.memory_space<vmem>>, vector<1x128xf32>
    %cst = arith.constant dense<0.000000e+00> : vector<8x128xf32>
    %3 = tpu.matmul %0, %1, %cst {dimension_numbers = #tpu.dot_dimension_numbers<[1], [0], [0], [1], [0, 0, 1, 1], [], []>} : vector<8x128xbf16>, vector<128x128xbf16>, vector<8x128xf32> -> vector<8x128xf32>
    %4 = vector.broadcast %2 : vector<1x128xf32> to vector<8x128xf32>
    %5 = arith.addf %3, %4 : vector<8x128xf32>
    %cst_5 = arith.constant 0.000000e+00 : f32
    %6 = vector.broadcast %cst_5 : f32 to vector<8x128xf32>
    %7 = arith.maximumf %5, %6 : vector<8x128xf32>
    %8 = arith.truncf %7 : vector<8x128xf32> to vector<8x128xbf16>
    %c0_6 = arith.constant 0 : index
    %c0_7 = arith.constant 0 : index
    %9 = vector.load %arg4[%c0_6, %c0_7] : memref<128x128xbf16, #tpu.memory_space<vmem>>, vector<128x128xbf16>
    %c0_8 = arith.constant 0 : index
    %c0_9 = arith.constant 0 : index
    %10 = vector.load %arg5[%c0_8, %c0_9] : memref<1x128xf32, #tpu.memory_space<vmem>>, vector<1x128xf32>
    %cst_10 = arith.constant dense<0.000000e+00> : vector<8x128xf32>
    %11 = tpu.matmul %8, %9, %cst_10 {dimension_numbers = #tpu.dot_dimension_numbers<[1], [0], [0], [1], [0, 0, 1, 1], [], []>} : vector<8x128xbf16>, vector<128x128xbf16>, vector<8x128xf32> -> vector<8x128xf32>
    %12 = vector.broadcast %10 : vector<1x128xf32> to vector<8x128xf32>
    %13 = arith.addf %11, %12 : vector<8x128xf32>
    %cst_11 = arith.constant 0.000000e+00 : f32
    %14 = vector.broadcast %cst_11 : f32 to vector<8x128xf32>
    %15 = arith.maximumf %13, %14 : vector<8x128xf32>
    %16 = arith.truncf %15 : vector<8x128xf32> to vector<8x128xbf16>
    %c0_12 = arith.constant 0 : index
    %c0_13 = arith.constant 0 : index
    %17 = vector.load %arg6[%c0_12, %c0_13] : memref<128x128xbf16, #tpu.memory_space<vmem>>, vector<128x128xbf16>
    %c0_14 = arith.constant 0 : index
    %c0_15 = arith.constant 0 : index
    %18 = vector.load %arg7[%c0_14, %c0_15] : memref<1x128xf32, #tpu.memory_space<vmem>>, vector<1x128xf32>
    %cst_16 = arith.constant dense<0.000000e+00> : vector<8x128xf32>
    %19 = tpu.matmul %16, %17, %cst_16 {dimension_numbers = #tpu.dot_dimension_numbers<[1], [0], [0], [1], [0, 0, 1, 1], [], []>} : vector<8x128xbf16>, vector<128x128xbf16>, vector<8x128xf32> -> vector<8x128xf32>
    %20 = vector.broadcast %18 : vector<1x128xf32> to vector<8x128xf32>
    %21 = arith.addf %19, %20 : vector<8x128xf32>
    %22 = arith.truncf %21 : vector<8x128xf32> to vector<8x128xbf16>
    %c0_17 = arith.constant 0 : index
    %c0_18 = arith.constant 0 : index
    %23 = vector.load %arg8[%c0_17, %c0_18] : memref<8x128xbf16, #tpu.memory_space<vmem>>, vector<8x128xbf16>
    tpu.vector_store %arg8[%c0_17, %c0_18], %22 {strides = array<i32>} : memref<8x128xbf16, #tpu.memory_space<vmem>>, vector<8x128xbf16>,
    return
  }
  func.func @transform_0(%arg0: i32) -> (i32, i32) {
    %c0_i32 = arith.constant 0 : i32
    %c0_i32_0 = arith.constant 0 : i32
    return %arg0, %c0_i32 : i32, i32
  }
  func.func @transform_1(%arg0: i32) -> (i32, i32) {
    %c0_i32 = arith.constant 0 : i32
    %c0_i32_0 = arith.constant 0 : i32
    %c0_i32_1 = arith.constant 0 : i32
    return %c0_i32, %c0_i32_0 : i32, i32
  }
  func.func @transform_2(%arg0: i32) -> (i32, i32) {
    %c0_i32 = arith.constant 0 : i32
    %c0_i32_0 = arith.constant 0 : i32
    %c0_i32_1 = arith.constant 0 : i32
    return %c0_i32, %c0_i32_0 : i32, i32
  }
  func.func @transform_3(%arg0: i32) -> (i32, i32) {
    %c0_i32 = arith.constant 0 : i32
    %c0_i32_0 = arith.constant 0 : i32
    %c0_i32_1 = arith.constant 0 : i32
    return %c0_i32, %c0_i32_0 : i32, i32
  }
  func.func @transform_4(%arg0: i32) -> (i32, i32) {
    %c0_i32 = arith.constant 0 : i32
    %c0_i32_0 = arith.constant 0 : i32
    %c0_i32_1 = arith.constant 0 : i32
    return %c0_i32, %c0_i32_0 : i32, i32
  }
  func.func @transform_5(%arg0: i32) -> (i32, i32) {
    %c0_i32 = arith.constant 0 : i32
    %c0_i32_0 = arith.constant 0 : i32
    %c0_i32_1 = arith.constant 0 : i32
    return %c0_i32, %c0_i32_0 : i32, i32
  }
  func.func @transform_6(%arg0: i32) -> (i32, i32) {
    %c0_i32 = arith.constant 0 : i32
    %c0_i32_0 = arith.constant 0 : i32
    %c0_i32_1 = arith.constant 0 : i32
    return %c0_i32, %c0_i32_0 : i32, i32
  }
  func.func @transform_7(%arg0: i32) -> (i32, i32) {
    %c0_i32 = arith.constant 0 : i32
    %c0_i32_0 = arith.constant 0 : i32
    return %arg0, %c0_i32 : i32, i32
  }
}

</mosaic_0001>

<bundles_post_ra>
// kernel: tpu_custom_call.1
= control target key start
LH: loop header
LB: loop body
LE: loop exit
PB: predicated region body
PF: predicated region fallthrough
CT: control target
= control target key end

     0   :  { %7 = vsyncpa [#allocation3], 0  ;;  %s633_s0 = inlined_call_operand.hbm [shape: f32[16,128], index: 0, kind: input, shape index: {}]   ;;  %s634_s1 = inlined_call_operand.hbm [shape: f32[8,128], index: 1, kind: input, shape index: {}]   ;;  %s635_s2 = inlined_call_operand.hbm [shape: f32[16,128], index: 2, kind: output, shape index: {}]  }
   0x1   :  { %9 = vsyncpa [#allocation3 + $0x1], 0 }
   0x2   :  { %10 = vsyncpa [#allocation6], 0 }
   0x3   :  { %11 = vsyncpa [#allocation4], 0 }
   0x4   :  { %13 = vsyncpa [#allocation4 + $0x1], 0  ;;  %s495_s9 = smov 0   ;;  %s497_s10 = smov 0  }
   0x5   :  { %s499_s11 = smov 0   ;;  %s501_s12 = smov 0  }
   0x6 LB: > { %s516_s13 = sadd.s32 4294967295, %s477_s12   ;;  %s276_s14 = sadd.s32 4294967294, %s477_s12   ;;  %s477_s12 = sphi %s501_s12, %s645_s12   ;;  %s473_s11 = sphi %s499_s11, %s644_s11   ;;  %s469_s10 = sphi %s497_s10, %s643_s10   ;;  %s465_s9 = sphi %s495_s9, %s642_s9  }
   0x7   : > { %p39_p0 = scmp.ne.s32.totalorder %s469_s10, %s465_s9  ;;  %p40_p1 = scmp.eq.s32.totalorder %s516_s13, 0 }
   0x8   : > { %p84_p2 = scmp.eq.s32.totalorder %s516_s13, 1  ;;  %p90_p3 = scmp.eq.s32.totalorder %s276_s14, 1 }
   0x9   : > { %p525_p4 = por %p40_p1, %p39_p0  ;;  %p277_p5 = scmp.ge.s32.totalorder %s477_s12, 1 }
   0xa   : > { %p530_p6 = por %p90_p3, %p39_p0  ;;  %p97_p7 = scmp.lt.s32.totalorder %s477_s12, 3 }
   0xb   : > { %s109_s19 = sshll.u32 %s634_s1, 4  ;;  %s479_s21 = smov [#allocation5]   ;;  %s110_s19 = int_to_ptr.hbm [resolvable:$true] %s109_s19 }
   0xc   : > { %p538_p8 = pnand %p277_p5, %p97_p7  ;;  %s111_s22 = sshll.u32 %s479_s21, 4  ;;  %s112_s22 = int_to_ptr.vmem [resolvable:$true] %s111_s22 }
   0xd   : > { %s548_s23 = sadd.s32 1, %s477_s12   ;;  %s26_s24 = sadd.s32 1, %s473_s11 }
   0xe   : > { %p298_p10 = pneg %p538_p8  ;;  %s23_s25 = ssub.s32 %s477_s12, %s548_s23 }
   0xf   : > { %p24_p12 = scmp.eq.s32.totalorder %s23_s25, 0  ;;  %p33_p13 = scmp.ne.s32.totalorder %s473_s11, %s469_s10 }
  0x10   : > { %p299_p11 = pnand %p298_p10, %p40_p1  ;;  %p34_p0 = scmp.eq.s32.totalorder %s477_s12, 0 }
  0x11   : > { %s557_s26 = scalar_select %p24_p12, %s473_s11, %s26_s24  }
  0x12   : > { %301 = dma.hbm_to_vmem [thread:$0]  (!%p299_p11), %s110_s19, 128, %s112_s22, [#allocation6]  }
  0x13   : > { %p561_p3 = por %p84_p2, %p33_p13  ;;  %p311_p5 = scmp.lt.s32.totalorder %s477_s12, 2 }
  0x14   : > { %s122_s28 = sand.u32 1, %s473_s11   ;;  %s281_s29 = sshll.u32 %s477_s12, 3 }
  0x15   : > { %p35_p7 = por %p34_p0, %p33_p13  ;;  %s280_s30 = sshll.u32 %s122_s28, 3 }
  0x16   : > { %s130_s5 = scalar_lea.hbm %s633_s0, %s281_s29  ;;  %s126_s7 = scalar_lea.vmem [#allocation2], %s280_s30 }
  0x17   : > { %s132_s6 = sshll.u32 %s130_s5, 4  ;;  %s134_s8 = sshll.u32 %s126_s7, 4  ;;  %s133_s6 = int_to_ptr.hbm [resolvable:$true] %s132_s6  ;;  %s135_s8 = int_to_ptr.vmem [resolvable:$true] %s134_s8 }
  0x18   : > { %p571_p10 = pnand %p311_p5, %p35_p7  ;;  %s123_s17 = scalar_lea.sflag [#allocation3], %s122_s28 }
  0x19   : > { %s377_s18 = sshra.s32 %s133_s6, 4  ;;  %s384_s24 = scalar_lea.hbm %s633_s0, 16  ;;  %s378_s18 = int_to_ptr.hbm [resolvable:$true] %s377_s18 }
  0x1a   : > { %s379_s19 = scalar_lea.hbm %s378_s18, 8  ;;  %p381_p11 = pneg %p571_p10 }
  0x1b   : > { %p380_p2 = scmp.ne.s32.totalorder %s378_s18, %s379_s19  ;;  %p385_p0 = scmp.lt.s32.totalorder %s378_s18, %s633_s0 }
  0x1c   : > { %p386_p5 = scmp.lt.s32.totalorder %s384_s24, %s379_s19 }
  0x1d   : > { %p382_p12 = pnand %p381_p11, %p380_p2 }
  0x1e   : > { %p387_p7 = por %p386_p5, %p385_p0 }
  0x1f   : > { %p383_p13 = pneg %p382_p12 }
  0x21   : > { %p388_p9 = pnand %p387_p7, %p383_p13 }
  0x23   : > { %391 = shalt.err (!%p388_p9)
}
  0x24   : > { %305 = dma.hbm_to_vmem [thread:$0]  (!%p571_p10), %s133_s6, 128, %s135_s8, %s123_s17  }
  0x25   : > { %143 = sbr.rel (%p538_p8) target bundleno = 60 (0x3c), region = 28  ;;  %s588_s28 = sand.u32 (!%p538_p8), 1, %s469_s10  }
  0x26   : > { %s283_s30 = sshll.u32 (!%p538_p8), %s588_s28, 3  ;;  %s146_s3 = scalar_lea.sflag (!%p538_p8), [#allocation3], %s588_s28 }
  0x27   : > { %s149_s4 = scalar_lea.vmem (!%p538_p8), [#allocation2], %s283_s30 }
  0x2a   : > { %452 = dma.done.wait (%p525_p4), %s146_s3, 128  }
  0x2b   : > { %454 = vsyncadd (%p525_p4), %s146_s3, 4294967168 }
  0x2c   : > { %456 = dma.done.wait (%p40_p1), [#allocation6], 128  }
  0x2d   : > { %458 = vsyncadd (%p40_p1), [#allocation6], 4294967168  ;;  %s287_s20 = sshll.u32 %s516_s13, 3  ;;  %s175_s8 = scalar_lea.vmem [#allocation7], %s283_s30  ;;  %v176_v0 = vld [vmem:[%s149_s4] sm:$0xff]  ;;  %v177_v1 = vld [vmem:[#allocation5] sm:$0xff] }
  0x2e   : > { %s191_s7 = scalar_lea.hbm %s635_s2, %s287_s20  ;;  %s193_s14 = sshll.u32 %s175_s8, 4  ;;  %v178_v2 = vadd.f32 %v177_v1, %v176_v0  ;;  %s194_s14 = int_to_ptr.vmem [resolvable:$true] %s193_s14 }
  0x2f   : > { %s195_s17 = sshll.u32 %s191_s7, 4  ;;  %s181_s15 = scalar_lea.sflag [#allocation4], %s588_s28  ;;  %s196_s17 = int_to_ptr.hbm [resolvable:$true] %s195_s17 }
  0x30   : > { %179 = vst [vmem:[%s175_s8] sm:$0xff] %v178_v2  ;;  %s421_s18 = sshra.s32 %s196_s17, 4  ;;  %s427_s22 = scalar_lea.hbm %s635_s2, 16  ;;  %s422_s18 = int_to_ptr.hbm [resolvable:$true] %s421_s18 }
  0x31   : > { %s423_s19 = scalar_lea.hbm %s422_s18, 8  ;;  %p428_p9 = scmp.lt.s32.totalorder %s422_s18, %s635_s2 }
  0x32   : > { %p424_p1 = scmp.ne.s32.totalorder %s422_s18, %s423_s19  ;;  %p429_p10 = scmp.lt.s32.totalorder %s427_s22, %s423_s19 }
  0x34   : > { %p425_p4 = pnand %p424_p1, %p561_p3  ;;  %p430_p2 = por %p429_p10, %p428_p9 }
  0x36   : > { %p426_p8 = pneg %p425_p4 }
  0x38   : > { %p431_p11 = pnand %p430_p2, %p426_p8 }
  0x3a   : > { %434 = shalt.err (!%p431_p11)
}
  0x3b   : > { %296 = dma.vmem_to_hbm [thread:$0]  (%p561_p3), %s194_s14, 128, %s196_s17, %s181_s15  }
  0x3c PF: > { %s207_s29 = sand.u32 1, %s465_s9   ;;  %p641_p12 = scmp.ge.s32.totalorder %s477_s12, 2 }
  0x3d   : > { %s208_s28 = scalar_lea.sflag [#allocation4], %s207_s29 }
  0x3e   : > { %p307_p13 = pnand %p641_p12, %p530_p6 }
  0x40   : > { %p308_p0 = pneg %p307_p13 }
  0x42   : > { %460 = dma.done.wait (%p308_p0), %s208_s28, 128  }
  0x43   : > { %462 = vsyncadd (%p308_p0), %s208_s28, 4294967168  ;;  %p16_p5 = scmp.ge.s32.totalorder %s548_s23, 4   ;;  %s642_s9 = smov %s469_s10 }
  0x44   : > { %s643_s10 = smov %s473_s11  ;;  %s644_s11 = smov %s557_s26 }
  0x45   : > { %s645_s12 = smov %s548_s23  ;;  %18 = sbr.rel (!%p16_p5) target bundleno = 6 (0x6), region = 77 }
  0x4a   :  { %214 = vsyncpa [#allocation3], 1 }
  0x4b   :  { %216 = vsyncpa [#allocation3 + $0x1], 1 }
  0x4c   :  { %217 = vsyncpa [#allocation6], 1 }
  0x4d   :  { %218 = vsyncpa [#allocation4], 1 }
  0x4e   :  { %220 = vsyncpa [#allocation4 + $0x1], 1 }

// kernel: fwd.1
= control target key start
LH: loop header
LB: loop body
LE: loop exit
PB: predicated region body
PF: predicated region fallthrough
CT: control target
= control target key end

     0   :  { %12 = vsyncpa [#allocation3], 0  ;;  %s602_s0 = inlined_call_operand.vmem [shape: bf16[8,128], index: 0, kind: input, shape index: {}]   ;;  %s603_s1 = inlined_call_operand.hbm [shape: bf16[128,128], index: 1, kind: input, shape index: {}]   ;;  %s604_s2 = inlined_call_operand.vmem [shape: f32[1,128], index: 2, kind: input, shape index: {}]   ;;  %s605_s3 = inlined_call_operand.hbm [shape: bf16[128,128], index: 3, kind: input, shape index: {}]   ;;  %s606_s4 = inlined_call_operand.vmem [shape: f32[1,128], index: 4, kind: input, shape index: {}]   ;;  %s607_s5 = inlined_call_operand.hbm [shape: bf16[128,128], index: 5, kind: input, shape index: {}]   ;;  %s608_s6 = inlined_call_operand.vmem [shape: f32[1,128], index: 6, kind: input, shape index: {}]   ;;  %s609_s7 = inlined_call_operand.vmem [shape: bf16[8,128], index: 7, kind: output, shape index: {}]  }
   0x1   :  { %13 = vsyncpa [#allocation5], 0  ;;  %s35_s26 = sshll.u32 %s605_s3, 4  ;;  %s533_s27 = smov [#allocation4]   ;;  %s36_s26 = int_to_ptr.hbm [resolvable:$true] %s35_s26 }
   0x2   :  { %s37_s28 = sshll.u32 %s533_s27, 4  ;;  %s20_s8 = sshll.u32 %s603_s1, 4  ;;  %s38_s28 = int_to_ptr.vmem [resolvable:$true] %s37_s28  ;;  %s21_s8 = int_to_ptr.hbm [resolvable:$true] %s20_s8 }
   0x3   :  { %s534_s9 = smov 64   ;;  %s535_s10 = smov 4  }
   0x4   :  { %43 = dma.hbm_to_vmem [thread:$0]  %s36_s26, 1024, %s38_s28, [#allocation5], %s534_s9, %s534_s9, %s535_s10  }
   0x5   :  { %s536_s11 = smov [#allocation2]   ;;  %s50_s15 = sshll.u32 %s607_s5, 4  ;;  %s51_s15 = int_to_ptr.hbm [resolvable:$true] %s50_s15 }
   0x6   :  { %s22_s12 = sshll.u32 %s536_s11, 4  ;;  %s537_s3 = smov [#allocation6]   ;;  %s23_s12 = int_to_ptr.vmem [resolvable:$true] %s22_s12 }
   0x7   :  { %28 = dma.hbm_to_vmem [thread:$0]  %s21_s8, 1024, %s23_s12, [#allocation3], %s534_s9, %s534_s9, %s535_s10  }
   0x8   :  { %s52_s16 = sshll.u32 %s537_s3, 4  ;;  %s53_s16 = int_to_ptr.vmem [resolvable:$true] %s52_s16 }
   0x9   :  { %58 = dma.hbm_to_vmem [thread:$0]  %s51_s15, 1024, %s53_s16, [#allocation5], %s534_s9, %s534_s9, %s535_s10  }
   0xa   :  { %529 = dma.done.wait [#allocation3], 1024  }
   0xb   :  { %530 = vsyncadd [#allocation3], 4294966272 }
   0xc   :  { %531 = dma.done.wait [#allocation5], 2048  }
   0xd   :  { %532 = vsyncadd [#allocation5], 4294965248  ;;  %v432_v0 = vld [vmem:[#allocation2 + $0x38] sm:$0xff]  ;;  %v431_v1 = vld [vmem:[#allocation2 + $0x30] sm:$0xff] }
   0xe   :  { %142 = vmatpush.bf16.msra.mxu0 %v432_v0  ;;  %v440_v2 = vld [vmem:[#allocation4 + $0x38] sm:$0xff]  ;;  %v439_v3 = vld [vmem:[#allocation4 + $0x30] sm:$0xff]  ;;  %v430_v4 = vld [vmem:[#allocation2 + $0x28] sm:$0xff] }
   0xf   :  { %225 = vmatpush.bf16.msra.mxu1 %v440_v2  ;;  %v438_v5 = vld [vmem:[#allocation4 + $0x28] sm:$0xff]  ;;  %v429_v6 = vld [vmem:[#allocation2 + $0x20] sm:$0xff]  ;;  %v428_v8 = vld [vmem:[#allocation2 + $0x18] sm:$0xff] }
  0x10   :  { %v437_v7 = vld [vmem:[#allocation4 + $0x20] sm:$0xff]  ;;  %v436_v9 = vld [vmem:[#allocation4 + $0x18] sm:$0xff]  ;;  %v427_v10 = vld [vmem:[#allocation2 + $0x10] sm:$0xff] }
  0x11   :  { %v435_v11 = vld [vmem:[#allocation4 + $0x10] sm:$0xff]  ;;  %v426_v12 = vld [vmem:[#allocation2 + $0x8] sm:$0xff]  ;;  %v425_v13 = vld [vmem:[#allocation2] sm:$0xff] }
  0x12   :  { %143 = vmatpush.bf16.msra.mxu0 %v431_v1  ;;  %v73_v14 = vld [vmem:[%s602_s0] sm:$0xf]  ;;  %v434_v15 = vld [vmem:[#allocation4 + $0x8] sm:$0xff]  ;;  %v448_v17 = vld [vmem:[#allocation6 + $0x38] sm:$0xff] }
  0x13   :  { %226 = vmatpush.bf16.msra.mxu1 %v439_v3  ;;  %v433_v16 = vld [vmem:[#allocation4] sm:$0xff]  ;;  %308 = vmatpush.bf16.msra.mxu2 %v448_v17  ;;  %v447_v18 = vld [vmem:[#allocation6 + $0x30] sm:$0xff]  ;;  %v446_v19 = vld [vmem:[#allocation6 + $0x28] sm:$0xff] }
  0x14   :  { %v445_v20 = vld [vmem:[#allocation6 + $0x20] sm:$0xff]  ;;  %v444_v21 = vld [vmem:[#allocation6 + $0x18] sm:$0xff]  ;;  %v443_v22 = vld [vmem:[#allocation6 + $0x10] sm:$0xff] }
  0x15   :  { %v454_v23 = vld [vmem:[%s604_s2] ss:$0 sm:$0xff]  ;;  %v442_v29 = vld [vmem:[#allocation6 + $0x8] sm:$0xff] }
  0x16   :  { %144 = vmatpush.bf16.msra.mxu0 %v430_v4  ;;  %v441_v30 = vld [vmem:[#allocation6] sm:$0xff] }
  0x17   :  { %227 = vmatpush.bf16.msra.mxu1 %v438_v5  ;;  %309 = vmatpush.bf16.msra.mxu2 %v447_v18  ;;  %v455_v31 = vld [vmem:[%s606_s4] ss:$0 sm:$0xff] }
  0x18   :  { %v456_v37 = vld [vmem:[%s608_s6] ss:$0 sm:$0xff] }
  0x1a   :  { %145 = vmatpush.bf16.msra.mxu0 %v429_v6 }
  0x1b   :  { %228 = vmatpush.bf16.msra.mxu1 %v437_v7  ;;  %310 = vmatpush.bf16.msra.mxu2 %v446_v19 }
  0x1e   :  { %146 = vmatpush.bf16.msra.mxu0 %v428_v8 }
  0x1f   :  { %229 = vmatpush.bf16.msra.mxu1 %v436_v9  ;;  %311 = vmatpush.bf16.msra.mxu2 %v445_v20 }
  0x22   :  { %147 = vmatpush.bf16.msra.mxu0 %v427_v10 }
  0x23   :  { %230 = vmatpush.bf16.msra.mxu1 %v435_v11  ;;  %312 = vmatpush.bf16.msra.mxu2 %v444_v21 }
  0x26   :  { %148 = vmatpush.bf16.msra.mxu0 %v426_v12 }
  0x27   :  { %231 = vmatpush.bf16.msra.mxu1 %v434_v15  ;;  %313 = vmatpush.bf16.msra.mxu2 %v443_v22 }
  0x2a   :  { %149 = vmatpush.bf16.msra.mxu0 %v425_v13 }
  0x2b   :  { %232 = vmatpush.bf16.msra.mxu1 %v433_v16  ;;  %314 = vmatpush.bf16.msra.mxu2 %v442_v29 }
  0x2d   :  { %150 = vmatmul.bf16.vlgmr.msra.gmra.mxu0 %v73_v14 }
  0x2f   :  { %315 = vmatpush.bf16.msra.mxu2 %v441_v30 }
  0xaa   :  { %v151_v24 = vpop.f32.mrf.mxu0 }
  0xab   :  { %v152_v25 = vadd.f32 %v454_v23, %v151_v24 }
  0xad   :  { %v155_v26 = vmax.f32 %v152_v25, 0.0 }
  0xaf   :  { %v156_v27 = vpack.c.bf16 %v155_v26, %v155_v26 }
  0xb1   :  { %233 = vmatmul.bf16.vlgmr.msra.gmra.mxu1 %v156_v27 }
  0xb2   :  { %v153_v28 = vpop.f32.mrf.mxu0 }
 0x12e   :  { %v234_v32 = vpop.f32.mrf.mxu1 }
 0x12f   :  { %v235_v33 = vadd.f32 %v455_v31, %v234_v32 }
 0x131   :  { %v238_v34 = vmax.f32 %v235_v33, 0.0 }
 0x133   :  { %v239_v35 = vpack.c.bf16 %v238_v34, %v238_v34 }
 0x135   :  { %316 = vmatmul.bf16.vlgmr.msra.gmra.mxu2 %v239_v35 }
 0x136   :  { %v236_v36 = vpop.f32.mrf.mxu1 }
 0x1b8   :  { %v317_v38 = vpop.f32.mrf.mxu2 }
 0x1b9   :  { %v318_v39 = vadd.f32 %v456_v37, %v317_v38 }
 0x1bb   :  { %v321_v40 = vpack.c.bf16 %v318_v39, %v318_v39 }
 0x1bd   :  { %322 = vst [vmem:[%s609_s7] sm:$0xf] %v321_v40 }
 0x1c0   :  { %v319_v41 = vpop.f32.mrf.mxu2 }
 0x1c1   :  { %327 = vsyncpa [#allocation3], 1 }
 0x1c2   :  { %328 = vsyncpa [#allocation5], 1 }

</bundles_post_ra>
